<compile_context>
chip_gen: v6e
topology: v6e:2x2x1
jax: 0.10.0
libtpu: 0.0.40
codegen_flags: <defaults>
</compile_context>

<pallas_src>
import functools

import numpy as np
import jax
import jax.numpy as jnp
from jax.experimental import pallas as pl
from jax.experimental.pallas import tpu as pltpu

BN_EPS = 1e-5


def _round_up(x, m):
    return x + (-x) % m


# ----------------------------------------------------------------------------
# Pallas kernels: tiled matmul fused with folded (bias+BN) scale/shift and ReLU.
# ----------------------------------------------------------------------------
def _mm_kernel_single_k(x_ref, w_ref, s_ref, t_ref, o_ref, *, relu):
    # Whole K in one block: no accumulator scratch, no init/finalize.
    y = jnp.dot(x_ref[...], w_ref[...], preferred_element_type=jnp.float32)
    y = y * s_ref[...] + t_ref[...]
    if relu:
        y = jnp.maximum(y, 0.0)
    o_ref[...] = y.astype(o_ref.dtype)


def _mm_kernel_loop_k(x_ref, w_ref, s_ref, t_ref, o_ref, acc_ref, *, relu):
    @pl.when(pl.program_id(2) == 0)
    def _():
        acc_ref[...] = jnp.zeros_like(acc_ref)

    acc_ref[...] += jnp.dot(x_ref[...], w_ref[...],
                            preferred_element_type=jnp.float32)

    @pl.when(pl.program_id(2) == pl.num_programs(2) - 1)
    def _():
        y = acc_ref[...] * s_ref[...] + t_ref[...]
        if relu:
            y = jnp.maximum(y, 0.0)
        o_ref[...] = y.astype(o_ref.dtype)


def matmul_fused(x, w, bias, bn_scale, bn_shift, relu):
    """relu(((x @ w) + bias) * bn_scale + bn_shift) with bias folded into shift.

    x: (M, K) f32, w: (K, N) f32.  Matmul runs in bf16 with f32 accumulation.
    """
    M, K = x.shape
    N = w.shape[1]

    # Fold conv bias into BN shift:  (x@w + b)*s + t == x@w*s + (b*s + t)
    shift = bias * bn_scale + bn_shift

    tn = 128
    Mp = _round_up(M, 16)                      # bf16 sublane packing
    tm = Mp if Mp <= 512 else 256              # cap tile so it fits v7x VMEM
    Mp = _round_up(Mp, tm)
    Kp = _round_up(K, 128)
    if Kp <= 4096:                             # whole-K weight tile fits VMEM
        tk = Kp
    else:
        tk = 2048
        Kp = _round_up(Kp, tk)
    Np = _round_up(N, tn)

    xp = jnp.pad(x, ((0, Mp - M), (0, Kp - K))).astype(jnp.bfloat16)
    wp = jnp.pad(w, ((0, Kp - K), (0, Np - N))).astype(jnp.bfloat16)
    sp = jnp.pad(bn_scale.reshape(1, -1).astype(jnp.float32), ((0, 0), (0, Np - N)))
    tp = jnp.pad(shift.reshape(1, -1).astype(jnp.float32), ((0, 0), (0, Np - N)))

    if Kp == tk:
        grid = (Mp // tm, Np // tn)
        out = pl.pallas_call(
            functools.partial(_mm_kernel_single_k, relu=relu),
            out_shape=jax.ShapeDtypeStruct((Mp, Np), jnp.float32),
            grid_spec=pltpu.PrefetchScalarGridSpec(
                num_scalar_prefetch=0,
                grid=grid,
                in_specs=[
                    pl.BlockSpec((tm, tk), lambda i, j: (i, 0)),
                    pl.BlockSpec((tk, tn), lambda i, j: (0, j)),
                    pl.BlockSpec((1, tn), lambda i, j: (0, j)),
                    pl.BlockSpec((1, tn), lambda i, j: (0, j)),
                ],
                out_specs=pl.BlockSpec((tm, tn), lambda i, j: (i, j)),
            ),
            compiler_params=pltpu.CompilerParams(
                dimension_semantics=("parallel", "parallel")),
        )(xp, wp, sp, tp)
    else:
        grid = (Mp // tm, Np // tn, Kp // tk)
        out = pl.pallas_call(
            functools.partial(_mm_kernel_loop_k, relu=relu),
            out_shape=jax.ShapeDtypeStruct((Mp, Np), jnp.float32),
            grid_spec=pltpu.PrefetchScalarGridSpec(
                num_scalar_prefetch=0,
                grid=grid,
                in_specs=[
                    pl.BlockSpec((tm, tk), lambda i, j, k: (i, k)),
                    pl.BlockSpec((tk, tn), lambda i, j, k: (k, j)),
                    pl.BlockSpec((1, tn), lambda i, j, k: (0, j)),
                    pl.BlockSpec((1, tn), lambda i, j, k: (0, j)),
                ],
                out_specs=pl.BlockSpec((tm, tn), lambda i, j, k: (i, j)),
                scratch_shapes=[pltpu.VMEM((tm, tn), jnp.float32)],
            ),
            compiler_params=pltpu.CompilerParams(
                dimension_semantics=("parallel", "parallel", "arbitrary")),
        )(xp, wp, sp, tp)
    return out[:M, :N]


# ----------------------------------------------------------------------------
# Conv2d (stride 1, "same"-style padding) as im2col + Pallas matmul.
# Activations are NHWC; weights are PyTorch OIHW.  Taps whose sampled window
# lies entirely in the zero padding are pruned (columns AND matching weight
# rows) before the matmul -- their contribution is exactly 0.
# ----------------------------------------------------------------------------
def conv2d_fused(x, w, bias, bn_scale, bn_shift, *, dilation=1, padding=0,
                 relu=True):
    N, H, W, C = x.shape
    O, I, kh, kw = w.shape

    if kh == 1 and kw == 1 and padding == 0:
        patches = x.reshape(N * H * W, C)
        wmat = jnp.transpose(w.reshape(O, I), (1, 0))
    else:
        keep = []
        for r in range(kh):
            lo_r = r * dilation - padding
            if lo_r >= H or lo_r + H - 1 < 0:      # entire row window is padding
                continue
            for s in range(kw):
                lo_c = s * dilation - padding
                if lo_c >= W or lo_c + W - 1 < 0:  # entire col window is padding
                    continue
                keep.append((r, s))
        xp = jnp.pad(x, ((0, 0), (padding, padding), (padding, padding), (0, 0)))
        taps = [xp[:, r * dilation:r * dilation + H,
                   s * dilation:s * dilation + W, :] for (r, s) in keep]
        patches = jnp.concatenate(taps, axis=-1).reshape(N * H * W, len(keep) * C)
        w_khwio = jnp.transpose(w, (2, 3, 1, 0))              # (kh, kw, I, O)
        wmat = jnp.concatenate([w_khwio[r, s] for (r, s) in keep], axis=0)

    out = matmul_fused(patches, wmat, bias, bn_scale, bn_shift, relu)
    return out.reshape(N, H, W, O)


# ----------------------------------------------------------------------------
# Bilinear upsampling with align_corners=True (UpsamplingBilinear2d) as two
# small interpolation matmuls on NHWC tensors (glue, negligible compute).
# ----------------------------------------------------------------------------
def _interp_matrix(out_size, in_size):
    if in_size == 1:
        return jnp.ones((out_size, 1), jnp.float32)
    if out_size == 1:
        m = np.zeros((1, in_size), np.float32)
        m[0, 0] = 1.0
        return jnp.asarray(m)
    src = np.arange(out_size) * (in_size - 1) / (out_size - 1)
    i0 = np.minimum(np.floor(src).astype(np.int64), in_size - 1)
    i1 = np.minimum(i0 + 1, in_size - 1)
    frac = (src - i0).astype(np.float32)
    m = np.zeros((out_size, in_size), np.float32)
    m[np.arange(out_size), i0] += 1.0 - frac
    m[np.arange(out_size), i1] += frac
    return jnp.asarray(m)


def upsample_bilinear_ac(x, out_h, out_w):
    # x: NHWC
    Ah = _interp_matrix(out_h, x.shape[1])
    Aw = _interp_matrix(out_w, x.shape[2])
    return jnp.einsum('nhwc,Hh,Ww->nHWc', x, Ah, Aw)


# ----------------------------------------------------------------------------
# Parameter init (deterministic, shapes from the module __init__).
# BatchNorm is folded for eval mode: gamma=1, beta=0, mean=0, var=1.
# ----------------------------------------------------------------------------
def _bn_fold(channels):
    scale = jnp.full((channels,), 1.0 / np.sqrt(1.0 + BN_EPS), jnp.float32)
    shift = jnp.zeros((channels,), jnp.float32)
    return scale, shift


def _conv_params(key, out_ch, in_ch, kh, kw):
    kw_key, kb_key = jax.random.split(key)
    fan_out = out_ch * kh * kw
    w = jax.random.normal(kw_key, (out_ch, in_ch, kh, kw), jnp.float32)
    w = w * np.sqrt(2.0 / fan_out)                      # kaiming_normal fan_out
    bound = 1.0 / np.sqrt(in_ch * kh * kw)
    b = jax.random.uniform(kb_key, (out_ch,), jnp.float32, -bound, bound)
    return w, b


def init_params(key, num_classes, dim_in=2048, dim_out=256):
    keys = jax.random.split(key, 16)
    p = {}
    # ASPP
    p['aspp_b1_w'], p['aspp_b1_b'] = _conv_params(keys[0], dim_out, dim_in, 1, 1)
    p['aspp_b2_w'], p['aspp_b2_b'] = _conv_params(keys[1], dim_out, dim_in, 3, 3)
    p['aspp_b3_w'], p['aspp_b3_b'] = _conv_params(keys[2], dim_out, dim_in, 3, 3)
    p['aspp_b4_w'], p['aspp_b4_b'] = _conv_params(keys[3], dim_out, dim_in, 3, 3)
    p['aspp_b5_w'], p['aspp_b5_b'] = _conv_params(keys[4], dim_out, dim_in, 1, 1)
    p['aspp_cat_w'], p['aspp_cat_b'] = _conv_params(keys[5], dim_out, dim_out * 5, 1, 1)
    # shortcut_conv
    p['sc_w'], p['sc_b'] = _conv_params(keys[6], 48, 256, 1, 1)
    # cat_conv (two 3x3 convs)
    p['cc1_w'], p['cc1_b'] = _conv_params(keys[7], 256, 256 + 48, 3, 3)
    p['cc2_w'], p['cc2_b'] = _conv_params(keys[8], 256, 256, 3, 3)
    # cls_conv
    p['cls_w'], p['cls_b'] = _conv_params(keys[9], num_classes, 256, 1, 1)
    p['bn_s'], p['bn_t'] = _bn_fold(dim_out)
    p['bn48_s'], p['bn48_t'] = _bn_fold(48)
    return p


# ----------------------------------------------------------------------------
# Forward passes (dropout layers are identity in eval mode).  NHWC internally.
# ----------------------------------------------------------------------------
def aspp_forward(x, p):
    # x: NHWC (N, h, w, 2048)
    s, t = p['bn_s'], p['bn_t']
    b1 = conv2d_fused(x, p['aspp_b1_w'], p['aspp_b1_b'], s, t,
                      dilation=1, padding=0, relu=True)
    b2 = conv2d_fused(x, p['aspp_b2_w'], p['aspp_b2_b'], s, t,
                      dilation=6, padding=6, relu=True)
    b3 = conv2d_fused(x, p['aspp_b3_w'], p['aspp_b3_b'], s, t,
                      dilation=12, padding=12, relu=True)
    b4 = conv2d_fused(x, p['aspp_b4_w'], p['aspp_b4_b'], s, t,
                      dilation=18, padding=18, relu=True)
    # branch5: global average pool -> 1x1 conv -> BN -> ReLU -> bilinear broadcast.
    # M is tiny (=N), so keep this in plain XLA (a Pallas launch is pure overhead).
    n, h, w, c = x.shape
    gm = jnp.mean(x, axis=(1, 2))                              # (N, 2048)
    w5 = jnp.transpose(p['aspp_b5_w'].reshape(p['aspp_b5_w'].shape[0], c), (1, 0))
    g = jnp.dot(gm, w5) + p['aspp_b5_b']
    g = jnp.maximum(g * s + t, 0.0)                            # (N, 256)
    # interpolate from 1x1 with align_corners=True == broadcast
    gfeat = jnp.broadcast_to(g[:, None, None, :], (n, h, w, g.shape[-1]))
    cat = jnp.concatenate([b1, b2, b3, b4, gfeat], axis=-1)    # (N, h, w, 1280)
    return conv2d_fused(cat, p['aspp_cat_w'], p['aspp_cat_b'], s, t,
                        dilation=1, padding=0, relu=True)


def deeplab_head_forward(deep_feat, shallow_feat, p):
    """deep_feat, shallow_feat in NCHW (module semantics); outputs in NCHW."""
    s, t = p['bn_s'], p['bn_t']
    x_deep = jnp.transpose(deep_feat, (0, 2, 3, 1))          # NHWC once at entry
    x_shallow = jnp.transpose(shallow_feat, (0, 2, 3, 1))

    feature_aspp_out = aspp_forward(x_deep, p)                # (N, 4, 4, 256)
    feature_aspp = feature_aspp_out                           # dropout1 (eval) = id
    feature_aspp = upsample_bilinear_ac(feature_aspp,
                                        x_deep.shape[1] * 4,
                                        x_deep.shape[2] * 4)
    feature_shallow = conv2d_fused(x_shallow, p['sc_w'], p['sc_b'],
                                   p['bn48_s'], p['bn48_t'],
                                   dilation=1, padding=0, relu=True)
    feature_cat = jnp.concatenate([feature_aspp, feature_shallow], axis=-1)
    r = conv2d_fused(feature_cat, p['cc1_w'], p['cc1_b'], s, t,
                     dilation=1, padding=1, relu=True)
    r = conv2d_fused(r, p['cc2_w'], p['cc2_b'], s, t,
                     dilation=1, padding=1, relu=True)
    nc = p['cls_w'].shape[0]
    r = conv2d_fused(r, p['cls_w'], p['cls_b'],
                     jnp.ones((nc,), jnp.float32), jnp.zeros((nc,), jnp.float32),
                     dilation=1, padding=0, relu=False)
    r = upsample_bilinear_ac(r, r.shape[1] * 4, r.shape[2] * 4)
    # Back to NCHW at the model boundary only.
    return (jnp.transpose(r, (0, 3, 1, 2)),
            jnp.transpose(feature_aspp_out, (0, 3, 1, 2)))


if __name__ == "__main__":
    num_classes = 6
    key = jax.random.PRNGKey(0)
    k_params, k_deep, k_shallow = jax.random.split(key, 3)

    params = init_params(k_params, num_classes)

    # Backbone feature maps (Xception, os=16) for a 64x64 input image:
    #   layers[-1]: (N, 2048, 4, 4)   layers[0]: (N, 256, 16, 16)
    deep_feat = jax.random.normal(k_deep, (2, 2048, 4, 4), jnp.float32)
    shallow_feat = jax.random.normal(k_shallow, (2, 256, 16, 16), jnp.float32)

    result, feature_aspp_out = deeplab_head_forward(deep_feat, shallow_feat, params)
    jax.block_until_ready(result)
    jax.block_until_ready(feature_aspp_out)

    assert result.shape == (2, num_classes, 64, 64), result.shape
    assert feature_aspp_out.shape == (2, 256, 4, 4), feature_aspp_out.shape
    print("KERNEL_OK")
</pallas_src>

<mosaic_0001>
module attributes {stable_mosaic.version = 11 : i64} {
  func.func @_mm_kernel_single_k(%arg0: i32, %arg1: i32, %arg2: memref<32x2048xbf16, #tpu.memory_space<vmem>>, %arg3: memref<2048x128xbf16, #tpu.memory_space<vmem>>, %arg4: memref<1x128xf32, #tpu.memory_space<vmem>>, %arg5: memref<1x128xf32, #tpu.memory_space<vmem>>, %arg6: memref<32x128xf32, #tpu.memory_space<vmem>>) attributes {dimension_semantics = [#tpu.dimension_semantics<parallel>, #tpu.dimension_semantics<parallel>], iteration_bounds = array<i64: 1, 2>, scalar_prefetch = 0 : i64, scratch_operands = 0 : i64, tpu.core_type = #tpu.core_type<tc>, window_params = [{transform_indices = @transform_0, window_bounds = array<i64: 32, 2048>}, {transform_indices = @transform_1, window_bounds = array<i64: 2048, 128>}, {transform_indices = @transform_2, window_bounds = array<i64: 1, 128>}, {transform_indices = @transform_3, window_bounds = array<i64: 1, 128>}, {transform_indices = @transform_4, window_bounds = array<i64: 32, 128>}]} {
    %c0 = arith.constant 0 : index
    %c0_0 = arith.constant 0 : index
    %0 = vector.load %arg2[%c0, %c0_0] : memref<32x2048xbf16, #tpu.memory_space<vmem>>, vector<32x2048xbf16>
    %c0_1 = arith.constant 0 : index
    %c0_2 = arith.constant 0 : index
    %1 = vector.load %arg3[%c0_1, %c0_2] : memref<2048x128xbf16, #tpu.memory_space<vmem>>, vector<2048x128xbf16>
    %cst = arith.constant dense<0.000000e+00> : vector<32x128xf32>
    %2 = tpu.matmul %0, %1, %cst {dimension_numbers = #tpu.dot_dimension_numbers<[1], [0], [0], [1], [0, 0, 1, 1], [], []>} : vector<32x2048xbf16>, vector<2048x128xbf16>, vector<32x128xf32> -> vector<32x128xf32>
    %c0_3 = arith.constant 0 : index
    %c0_4 = arith.constant 0 : index
    %3 = vector.load %arg4[%c0_3, %c0_4] : memref<1x128xf32, #tpu.memory_space<vmem>>, vector<1x128xf32>
    %4 = vector.broadcast %3 : vector<1x128xf32> to vector<32x128xf32>
    %5 = arith.mulf %2, %4 : vector<32x128xf32>
    %c0_5 = arith.constant 0 : index
    %c0_6 = arith.constant 0 : index
    %6 = vector.load %arg5[%c0_5, %c0_6] : memref<1x128xf32, #tpu.memory_space<vmem>>, vector<1x128xf32>
    %7 = vector.broadcast %6 : vector<1x128xf32> to vector<32x128xf32>
    %8 = arith.addf %5, %7 : vector<32x128xf32>
    %cst_7 = arith.constant 0.000000e+00 : f32
    %9 = vector.broadcast %cst_7 : f32 to vector<32x128xf32>
    %10 = arith.maximumf %8, %9 : vector<32x128xf32>
    %c0_8 = arith.constant 0 : index
    %c0_9 = arith.constant 0 : index
    %11 = vector.load %arg6[%c0_8, %c0_9] : memref<32x128xf32, #tpu.memory_space<vmem>>, vector<32x128xf32>
    tpu.vector_store %arg6[%c0_8, %c0_9], %10 {strides = array<i32>} : memref<32x128xf32, #tpu.memory_space<vmem>>, vector<32x128xf32>,
    return
  }
  func.func @transform_0(%arg0: i32, %arg1: i32) -> (i32, i32) {
    %c0_i32 = arith.constant 0 : i32
    %c0_i32_0 = arith.constant 0 : i32
    return %arg0, %c0_i32 : i32, i32
  }
  func.func @transform_1(%arg0: i32, %arg1: i32) -> (i32, i32) {
    %c0_i32 = arith.constant 0 : i32
    %c0_i32_0 = arith.constant 0 : i32
    return %c0_i32, %arg1 : i32, i32
  }
  func.func @transform_2(%arg0: i32, %arg1: i32) -> (i32, i32) {
    %c0_i32 = arith.constant 0 : i32
    %c0_i32_0 = arith.constant 0 : i32
    return %c0_i32, %arg1 : i32, i32
  }
  func.func @transform_3(%arg0: i32, %arg1: i32) -> (i32, i32) {
    %c0_i32 = arith.constant 0 : i32
    %c0_i32_0 = arith.constant 0 : i32
    return %c0_i32, %arg1 : i32, i32
  }
  func.func @transform_4(%arg0: i32, %arg1: i32) -> (i32, i32) {
    %c0_i32 = arith.constant 0 : i32
    return %arg0, %arg1 : i32, i32
  }
}

</mosaic_0001>

<bundles_post_ra>
// kernel: tpu_custom_call.1
= control target key start
LH: loop header
LB: loop body
LE: loop exit
PB: predicated region body
PF: predicated region fallthrough
CT: control target
= control target key end

     0   :  { %9 = vsyncpa [#allocation3], 0  ;;  %s3157_s0 = inlined_call_operand.hbm [shape: bf16[32,2048], index: 0, kind: input, shape index: {}]   ;;  %s3158_s1 = inlined_call_operand.hbm [shape: bf16[2048,256], index: 1, kind: input, shape index: {}]   ;;  %s3159_s2 = inlined_call_operand.vmem [shape: f32[1,256], index: 2, kind: input, shape index: {}]   ;;  %s3160_s3 = inlined_call_operand.vmem [shape: f32[1,256], index: 3, kind: input, shape index: {}]   ;;  %s3161_s4 = inlined_call_operand.hbm [shape: f32[32,256], index: 4, kind: output, shape index: {}]  }
   0x1   :  { %10 = vsyncpa [#allocation6], 0 }
   0x2   :  { %12 = vsyncpa [#allocation6 + $0x1], 0 }
   0x3   :  { %13 = vsyncpa [#allocation4], 0 }
   0x4   :  { %15 = vsyncpa [#allocation4 + $0x1], 0  ;;  %s2837_s15 = smov 0   ;;  %s2839_s16 = smov 0  }
   0x5   :  { %s2841_s17 = smov 0   ;;  %s2843_s18 = smov 0  }
   0x6   :  { %s2845_s19 = smov 0   ;;  %s2847_s20 = smov 0  }
   0x7 LB: > { %3168 = sst [smem:[#allocation11_spill]] %s2780_s15  ;;  %s2053_s21 = sadd.s32 4294967295, %s2800_s20   ;;  %s2800_s20 = sphi %s2847_s20, %s21_s20   ;;  %s2796_s19 = sphi %s2845_s19, %s3191_s19   ;;  %s2792_s18 = sphi %s2843_s18, %s3190_s18   ;;  %s2788_s17 = sphi %s2841_s17, %s3189_s17   ;;  %s2784_s16 = sphi %s2839_s16, %s3188_s16   ;;  %s2780_s15 = sphi %s2837_s15, %s3187_s15  }
   0x8   : > { %3169 = sst [smem:[#allocation12_spill]] %s2800_s20  ;;  %s2054_s22 = sadd.s32 4294967294, %s2800_s20  }
   0x9   : > { %p73_p0 = scmp.ne.s32.totalorder %s2788_s17, %s2784_s16  ;;  %p74_p1 = scmp.eq.s32.totalorder %s2800_s20, 0 }
   0xa   : > { %p79_p2 = scmp.ne.s32.totalorder %s2784_s16, %s2780_s15  ;;  %p2874_p3 = scmp.eq.s32.totalorder %s2053_s21, 0 }
   0xb   : > { %p2878_p4 = por %p74_p1, %p73_p0  ;;  %p157_p5 = scmp.eq.s32.totalorder %s2053_s21, 1 }
   0xc   : > { %p2884_p6 = por %p2874_p3, %p79_p2  ;;  %p163_p7 = scmp.eq.s32.totalorder %s2054_s22, 1 }
   0xd   : > { %p2888_p8 = por %p157_p5, %p73_p0  ;;  %p2055_p9 = scmp.ge.s32.totalorder %s2800_s20, 1 }
   0xe   : > { %s3172_s25 = scalar_select %p2884_p6, 1, 0 }
   0xf   : > { %s3173_s26 = scalar_select %p2888_p8, 1, 0 }
  0x10   : > { %p2893_p10 = por %p163_p7, %p79_p2  ;;  %p170_p11 = scmp.lt.s32.totalorder %s2800_s20, 3 }
  0x11   : > { %s2802_s29 = smov [#allocation2]   ;;  %p2475_p1 = scmp.lt.s32.totalorder %s2800_s20, 2 }
  0x12   : > { %s3174_s27 = scalar_select %p2893_p10, 1, 0 }
  0x13   : > { %p2898_p12 = pnand %p2055_p9, %p170_p11  ;;  %s186_s30 = sshll.u32 %s2802_s29, 4  ;;  %s187_s30 = int_to_ptr.vmem [resolvable:$true] %s186_s30 }
  0x14   : > { %3175 = sst [smem:[#allocation13_spill]] %s3174_s27  ;;  %p2914_p2 = pnand %p2475_p1, %p2878_p4 }
  0x15   : > { %p2462_p13 = pneg %p2898_p12  ;;  %s30_s7 = sadd.s32 1, %s2796_s19 }
  0x16   : > { %s2673_s8 = scalar_lea.vmem %s187_s30, 4096  ;;  %p2681_p0 = scmp.lt.s32.totalorder %s187_s30, %s187_s30 }
  0x17   : > { %p2908_p5 = pnand %p2462_p13, %p2874_p3  ;;  %p2674_p9 = scmp.ne.s32.totalorder %s187_s30, %s2673_s8 }
  0x18   : > { %p2682_p8 = scmp.lt.s32.totalorder %s2673_s8, %s2673_s8 }
  0x19   : > { %p2664_p7 = pneg %p2908_p5 }
  0x1a   : > { %p2683_p6 = por %p2682_p8, %p2681_p0 }
  0x1b   : > { %p2676_p11 = pnand %p2674_p9, %p2664_p7 }
  0x1d   : > { %p2677_p10 = pneg %p2676_p11 }
  0x1f   : > { %p2684_p13 = pnand %p2683_p6, %p2677_p10 }
  0x21   : > { %2687 = shalt.err (!%p2684_p13)
}
  0x22   : > { %s2803_s9 = smov 1024   ;;  %s2804_s10 = smov 64  }
  0x23   : > { %2465 = dma.hbm_to_vmem [thread:$0]  (!%p2908_p5), %s3157_s0, 4096, %s187_s30, [#allocation3], %s2803_s9, %s2803_s9, %s2804_s10  }
  0x24   : > { %p31_p4 = scmp.ge.s32.totalorder %s30_s7, 2  ;;  %s66_s13 = sadd.s32 1, %s2788_s17 }
  0x25   : > { %s200_s14 = sand.u32 1, %s2788_s17   ;;  %s2059_s24 = sshll.u32 %s2796_s19, 6 }
  0x26   : > { %s3193_s7 = smov (%p31_p4, %s30_s7), 0  ;;  %s2058_s21 = sshll.u32 %s200_s14, 10 }
  0x27   : > { %s63_s22 = ssub.s32 %s2796_s19, %s3193_s7  ;;  %s209_s5 = scalar_lea.hbm %s3158_s1, %s2059_s24 }
  0x28   : > { %p64_p6 = scmp.eq.s32.totalorder %s63_s22, 0  ;;  %s204_s20 = scalar_lea.vmem [#allocation5], %s2058_s21 }
  0x29   : > { %s210_s27 = sshll.u32 %s204_s20, 4  ;;  %s201_s30 = scalar_lea.sflag [#allocation6], %s200_s14  ;;  %s211_s27 = int_to_ptr.vmem [resolvable:$true] %s210_s27 }
  0x2a   : > { %s2938_s15 = scalar_select %p64_p6, %s2788_s17, %s66_s13  }
  0x2b   : > { %p2690_p8 = pneg %p2914_p2  ;;  %s2701_s9 = scalar_lea.vmem %s211_s27, 16384 }
  0x2c   : > { %p2702_p10 = scmp.ne.s32.totalorder %s211_s27, %s2701_s9  ;;  %s2805_s11 = smov [#allocation5]  }
  0x2d   : > { %s2706_s12 = sshll.u32 %s2805_s11, 4  ;;  %s2707_s12 = int_to_ptr.vmem [resolvable:$false] %s2706_s12 }
  0x2e   : > { %p2704_p0 = pnand %p2702_p10, %p2690_p8  ;;  %s2708_s22 = scalar_lea.vmem %s2707_s12, 32768 }
  0x2f   : > { %p2709_p5 = scmp.lt.s32.totalorder %s211_s27, %s2707_s12  ;;  %p2710_p7 = scmp.lt.s32.totalorder %s2708_s22, %s2701_s9 }
  0x30   : > { %p2705_p1 = pneg %p2704_p0 }
  0x31   : > { %p2711_p9 = por %p2710_p7, %p2709_p5 }
  0x33   : > { %p2712_p11 = pnand %p2711_p9, %p2705_p1 }
  0x35   : > { %2715 = shalt.err (!%p2712_p11)
}
  0x36   : > { %s2806_s20 = smov 128   ;;  %s2807_s13 = smov 4  }
  0x37   : > { %2469 = dma.hbm_to_vmem [thread:$0]  (!%p2914_p2), %s209_s5, 16384, %s211_s27, %s201_s30, %s2806_s20, %s2804_s10, %s2807_s13  }
  0x38   : > { %234 = sbr.rel (%p2898_p12) target bundleno = 430 (0x1ae), region = 36 }
  0x3d   : > { %2767 = dma.done.wait (%p2874_p3), [#allocation3], 4096  }
  0x3e   : > { %2769 = vsyncadd (%p2874_p3), [#allocation3], 4294963200  ;;  %s2952_s14 = sand.u32 1, %s2784_s16   ;;  %p3179_p2 = scmp.ne.s32.totalorder %s3172_s25, 0 }
  0x3f   : > { %s2062_s21 = sshll.u32 %s2952_s14, 10  ;;  %s241_s24 = scalar_lea.sflag [#allocation6], %s2952_s14 }
  0x40   : > { %s2956_s6 = scalar_lea.vmem [#allocation5], %s2062_s21 }
  0x41   : > { %2771 = dma.done.wait (%p3179_p2), %s241_s24, 16384  }
  0x42   : > { %2773 = vsyncadd (%p3179_p2), %s241_s24, 4294950912  ;;  %v2534_v0 = vld [vmem:[%s2956_s6 + $0x78] sm:$0xff]   ;;  %v2538_v4 = vld [vmem:[%s2956_s6 + $0x70] sm:$0xff]   ;;  %p276_p3 = scmp.lt.s32.totalorder %s2792_s18, 1  ;;  %s2063_s5 = sshll.u32 %s2952_s14, 5 }
  0x43   : > { %v2535_v1 = vld [vmem:[%s2956_s6 + $0xf8] sm:$0xff]   ;;  %2230 = vmatprep.subr.bf16.mxu0 %v2534_v0  ;;  %v2539_v5 = vld [vmem:[%s2956_s6 + $0xf0] sm:$0xff]   ;;  %v2542_v8 = vld [vmem:[%s2956_s6 + $0x68] sm:$0xff]   ;;  %s274_s30 = scalar_lea.vmem [#allocation7], %s2063_s5  ;;  %s2227_s11 = sshll.u32 %s2792_s18, 7 }
  0x44   : > { %v2536_v2 = vld [vmem:[%s2956_s6 + $0x38] sm:$0xff]   ;;  %2258 = vmatprep.subr.bf16.mxu1 %v2535_v1  ;;  %v2540_v6 = vld [vmem:[%s2956_s6 + $0x30] sm:$0xff]   ;;  %v2543_v9 = vld [vmem:[%s2956_s6 + $0xe8] sm:$0xff]   ;;  %s3092_s23 = scalar_select %p276_p3, %s2792_s18, 1 }
  0x45   : > { %v2537_v3 = vld [vmem:[%s2956_s6 + $0xb8] sm:$0xff]   ;;  %2231 = vmatpush3.bf16.msra.mxu0 %v2536_v2  ;;  %v2541_v7 = vld [vmem:[%s2956_s6 + $0xb0] sm:$0xff]   ;;  %v2544_v10 = vld [vmem:[%s2956_s6 + $0x28] sm:$0xff]   ;;  %s1938_s9 = sshll.u32 %s274_s30, 4  ;;  %s3109_s20 = scalar_lea.hbm %s3161_s4, %s2227_s11  ;;  %s3104_s9 = int_to_ptr.vmem [resolvable:$true] %s1938_s9 }
  0x46   : > { %2259 = vmatpush3.bf16.msra.mxu1 %v2537_v3  ;;  %2232 = vmatprep.subr.bf16.mxu0 %v2538_v4  ;;  %v2545_v11 = vld [vmem:[%s2956_s6 + $0xa8] sm:$0xff]   ;;  %v2546_v12 = vld [vmem:[%s2956_s6 + $0x60] sm:$0xff]   ;;  %v2550_v16 = vld [vmem:[%s2956_s6 + $0x58] sm:$0xff]   ;;  %s278_s28 = scalar_lea.vmem %s3159_s2, %s3092_s23  ;;  %s281_s8 = scalar_lea.vmem %s3160_s3, %s3092_s23 }
  0x47   : > { %2260 = vmatprep.subr.bf16.mxu1 %v2539_v5  ;;  %v2547_v13 = vld [vmem:[%s2956_s6 + $0xe0] sm:$0xff]   ;;  %v2551_v17 = vld [vmem:[%s2956_s6 + $0xd8] sm:$0xff]   ;;  %v2554_v20 = vld [vmem:[%s2956_s6 + $0x50] sm:$0xff]   ;;  %s1923_s13 = scalar_lea.sflag [#allocation4], %s2952_s14  ;;  %s2716_s21 = scalar_lea.vmem %s3104_s9, 512 }
  0x48   : > { %v2548_v14 = vld [vmem:[%s2956_s6 + $0x20] sm:$0xff]   ;;  %v2552_v18 = vld [vmem:[%s2956_s6 + $0x18] sm:$0xff]   ;;  %v2555_v21 = vld [vmem:[%s2956_s6 + $0xd0] sm:$0xff]   ;;  %p2717_p12 = scmp.ne.s32.totalorder %s3104_s9, %s2716_s21  ;;  %p3180_p13 = scmp.ne.s32.totalorder %s3173_s26, 0 }
  0x49   : > { %2233 = vmatpush3.bf16.msra.mxu0 %v2540_v6  ;;  %v2549_v15 = vld [vmem:[%s2956_s6 + $0xa0] sm:$0xff]   ;;  %v2553_v19 = vld [vmem:[%s2956_s6 + $0x98] sm:$0xff]   ;;  %v2556_v22 = vld [vmem:[%s2956_s6 + $0x10] sm:$0xff]   ;;  %s2808_s18 = smov [#allocation7]  }
  0x4a   : > { %2261 = vmatpush3.bf16.msra.mxu1 %v2541_v7  ;;  %2234 = vmatprep.subr.bf16.mxu0 %v2542_v8  ;;  %v2557_v23 = vld [vmem:[%s2956_s6 + $0x90] sm:$0xff]   ;;  %v2558_v24 = vld [vmem:[%s2956_s6 + $0x48] sm:$0xff]   ;;  %v2562_v28 = vld [vmem:[%s2956_s6 + $0x40] sm:$0xff]   ;;  %p2718_p4 = pnand %p2717_p12, %p3180_p13  ;;  %s2720_s24 = sshll.u32 %s2808_s18, 4  ;;  %s2721_s24 = int_to_ptr.vmem [resolvable:$false] %s2720_s24 }
  0x4b   : > { %2262 = vmatprep.subr.bf16.mxu1 %v2543_v9  ;;  %v2559_v25 = vld [vmem:[%s2956_s6 + $0xc8] sm:$0xff]   ;;  %v2563_v29 = vld [vmem:[%s2956_s6 + $0xc0] sm:$0xff]   ;;  %v2566_v40 = vld [vmem:[%s2956_s6 + $0x178] sm:$0xff]   ;;  %p2723_p8 = scmp.lt.s32.totalorder %s3104_s9, %s2721_s24 }
  0x4c   : > { %v2560_v26 = vld [vmem:[%s2956_s6 + $0x8] sm:$0xff]   ;;  %v2564_v30 = vld [vmem:[%s2956_s6] sm:$0xff]   ;;  %v2567_v41 = vld [vmem:[%s2956_s6 + $0x1f8] sm:$0xff]   ;;  %p2719_p6 = pneg %p2718_p4 }
  0x4d   : > { %2235 = vmatpush3.bf16.msra.mxu0 %v2544_v10  ;;  %v2561_v27 = vld [vmem:[%s2956_s6 + $0x88] sm:$0xff]   ;;  %v2565_v31 = vld [vmem:[%s2956_s6 + $0x80] sm:$0xff]   ;;  %v2568_v42 = vld [vmem:[%s2956_s6 + $0x138] sm:$0xff]  }
  0x4e   : > { %2263 = vmatpush3.bf16.msra.mxu1 %v2545_v11  ;;  %2236 = vmatprep.subr.bf16.mxu0 %v2546_v12  ;;  %v284_v32 = vld [vmem:[#allocation2] sm:$0xff]  ;;  %v285_v34 = vld [vmem:[#allocation2 + $0x8] sm:$0xff]  ;;  %v2569_v43 = vld [vmem:[%s2956_s6 + $0x1b8] sm:$0xff]  }
  0x4f   : > { %2264 = vmatprep.subr.bf16.mxu1 %v2547_v13  ;;  %v292_v33 = vld [vmem:[#allocation2 + $0x40] sm:$0xff]  ;;  %v293_v37 = vld [vmem:[#allocation2 + $0x48] sm:$0xff]  ;;  %v2570_v44 = vld [vmem:[%s2956_s6 + $0x170] sm:$0xff]  }
  0x50   : > { %v2064_v35 = vcombine.low %v284_v32, %v292_v33  ;;  %v2065_v36 = vcombine.high %v284_v32, %v292_v33  ;;  %v2066_v38 = vcombine.low %v285_v34, %v293_v37  ;;  %v2067_v39 = vcombine.high %v285_v34, %v293_v37  ;;  %v2571_v45 = vld [vmem:[%s2956_s6 + $0x1f0] sm:$0xff]   ;;  %v2574_v48 = vld [vmem:[%s2956_s6 + $0x168] sm:$0xff]   ;;  %v2578_v52 = vld [vmem:[%s2956_s6 + $0x160] sm:$0xff]  }
  0x51   : > { %2237 = vmatpush3.bf16.msra.mxu0 %v2548_v14  ;;  %v2572_v46 = vld [vmem:[%s2956_s6 + $0x130] sm:$0xff]   ;;  %v2575_v49 = vld [vmem:[%s2956_s6 + $0x1e8] sm:$0xff]   ;;  %v2579_v53 = vld [vmem:[%s2956_s6 + $0x1e0] sm:$0xff]  }
  0x52   : > { %2265 = vmatpush3.bf16.msra.mxu1 %v2549_v15  ;;  %2238 = vmatprep.subr.bf16.mxu0 %v2550_v16  ;;  %v2573_v47 = vld [vmem:[%s2956_s6 + $0x1b0] sm:$0xff]   ;;  %v2576_v50 = vld [vmem:[%s2956_s6 + $0x128] sm:$0xff]   ;;  %v2580_v54 = vld [vmem:[%s2956_s6 + $0x120] sm:$0xff]  }
  0x53   : > { %2266 = vmatprep.subr.bf16.mxu1 %v2551_v17  ;;  %1532 = vmatprep.mubr.bf16.mxu0 %v2065_v36  ;;  %v2577_v51 = vld [vmem:[%s2956_s6 + $0x1a8] sm:$0xff]   ;;  %v2581_v55 = vld [vmem:[%s2956_s6 + $0x1a0] sm:$0xff]   ;;  %v2582_v56 = vld [vmem:[%s2956_s6 + $0x158] sm:$0xff]  }
  0x54   : > { %1581 = vmatprep.mubr.bf16.mxu1 %v2067_v39  ;;  %v2583_v57 = vld [vmem:[%s2956_s6 + $0x1d8] sm:$0xff]   ;;  %v300_v60 = vld [vmem:[#allocation2 + $0x80] sm:$0xff]  ;;  %v301_v63 = vld [vmem:[#allocation2 + $0x88] sm:$0xff] }
  0x55   : > { %2239 = vmatpush3.bf16.msra.mxu0 %v2552_v18  ;;  %v2584_v58 = vld [vmem:[%s2956_s6 + $0x118] sm:$0xff]   ;;  %v308_v61 = vld [vmem:[#allocation2 + $0xc0] sm:$0xff]  ;;  %v309_v0 = vld [vmem:[#allocation2 + $0xc8] sm:$0xff] }
  0x56   : > { %2267 = vmatpush3.bf16.msra.mxu1 %v2553_v19  ;;  %2240 = vmatprep.subr.bf16.mxu0 %v2554_v20  ;;  %v2585_v59 = vld [vmem:[%s2956_s6 + $0x198] sm:$0xff]   ;;  %v2081_v62 = vcombine.high %v300_v60, %v308_v61  ;;  %v2080_v1 = vcombine.low %v300_v60, %v308_v61  ;;  %v2083_v2 = vcombine.high %v301_v63, %v309_v0  ;;  %v2586_v4 = vld [vmem:[%s2956_s6 + $0x150] sm:$0xff]   ;;  %v2590_v8 = vld [vmem:[%s2956_s6 + $0x148] sm:$0xff]  }
  0x57   : > { %2268 = vmatprep.subr.bf16.mxu1 %v2555_v21  ;;  %v2082_v3 = vcombine.low %v301_v63, %v309_v0  ;;  %v2587_v5 = vld [vmem:[%s2956_s6 + $0x1d0] sm:$0xff]   ;;  %v2591_v9 = vld [vmem:[%s2956_s6 + $0x1c8] sm:$0xff]   ;;  %v2594_v12 = vld [vmem:[%s2956_s6 + $0x140] sm:$0xff]  }
  0x58   : > { %v2588_v6 = vld [vmem:[%s2956_s6 + $0x110] sm:$0xff]   ;;  %v2592_v10 = vld [vmem:[%s2956_s6 + $0x108] sm:$0xff]   ;;  %v2595_v13 = vld [vmem:[%s2956_s6 + $0x1c0] sm:$0xff]  }
  0x59   : > { %2241 = vmatpush3.bf16.msra.mxu0 %v2556_v22  ;;  %v2589_v7 = vld [vmem:[%s2956_s6 + $0x190] sm:$0xff]   ;;  %v2593_v11 = vld [vmem:[%s2956_s6 + $0x188] sm:$0xff]   ;;  %v2596_v14 = vld [vmem:[%s2956_s6 + $0x100] sm:$0xff]  }
  0x5a   : > { %2269 = vmatpush3.bf16.msra.mxu1 %v2557_v23  ;;  %2242 = vmatprep.subr.bf16.mxu0 %v2558_v24  ;;  %v2597_v15 = vld [vmem:[%s2956_s6 + $0x180] sm:$0xff]   ;;  %v286_v16 = vld [vmem:[#allocation2 + $0x10] sm:$0xff]  ;;  %v287_v18 = vld [vmem:[#allocation2 + $0x18] sm:$0xff] }
  0x5b   : > { %2270 = vmatprep.subr.bf16.mxu1 %v2559_v25  ;;  %v294_v17 = vld [vmem:[#allocation2 + $0x50] sm:$0xff]  ;;  %v295_v19 = vld [vmem:[#allocation2 + $0x58] sm:$0xff]  ;;  %v2606_v36 = vld [vmem:[%s2956_s6 + $0x268] sm:$0xff]  }
  0x5c   : > { %v2068_v20 = vcombine.low %v286_v16, %v294_v17  ;;  %v2069_v21 = vcombine.high %v286_v16, %v294_v17  ;;  %v2070_v22 = vcombine.low %v287_v18, %v295_v19  ;;  %v2071_v23 = vcombine.high %v287_v18, %v295_v19  ;;  %v2598_v24 = vld [vmem:[%s2956_s6 + $0x278] sm:$0xff]   ;;  %v302_v32 = vld [vmem:[#allocation2 + $0x90] sm:$0xff]  ;;  %v2607_v37 = vld [vmem:[%s2956_s6 + $0x2e8] sm:$0xff]  }
  0x5d   : > { %2243 = vmatpush3.bf16.msra.mxu0 %v2560_v26  ;;  %v2599_v25 = vld [vmem:[%s2956_s6 + $0x2f8] sm:$0xff]   ;;  %v310_v33 = vld [vmem:[#allocation2 + $0xd0] sm:$0xff]  ;;  %v2626_v60 = vld [vmem:[%s2956_s6 + $0x240] sm:$0xff]  }
  0x5e   : > { %2271 = vmatpush3.bf16.msra.mxu1 %v2561_v27  ;;  %2244 = vmatprep.subr.bf16.mxu0 %v2562_v28  ;;  %v2600_v26 = vld [vmem:[%s2956_s6 + $0x238] sm:$0xff]   ;;  %v2602_v28 = vld [vmem:[%s2956_s6 + $0x270] sm:$0xff]   ;;  %v2085_v34 = vcombine.high %v302_v32, %v310_v33  ;;  %v2627_v61 = vld [vmem:[%s2956_s6 + $0x2c0] sm:$0xff]  }
  0x5f   : > { %2272 = vmatprep.subr.bf16.mxu1 %v2563_v29  ;;  %v2601_v27 = vld [vmem:[%s2956_s6 + $0x2b8] sm:$0xff]   ;;  %v2603_v29 = vld [vmem:[%s2956_s6 + $0x2f0] sm:$0xff]   ;;  %v2629_v63 = vld [vmem:[%s2956_s6 + $0x280] sm:$0xff]  }
  0x60   : > { %v311_v39 = vld [vmem:[#allocation2 + $0xd8] sm:$0xff]  ;;  %v288_v0 = vld [vmem:[#allocation2 + $0x20] sm:$0xff] }
  0x61   : > { %2245 = vmatpush3.bf16.msra.mxu0 %v2564_v30  ;;  %v2604_v30 = vld [vmem:[%s2956_s6 + $0x230] sm:$0xff]   ;;  %v304_v16 = vld [vmem:[#allocation2 + $0xa0] sm:$0xff] }
  0x62   : > { %2273 = vmatpush3.bf16.msra.mxu1 %v2565_v31  ;;  %2286 = vmatprep.subr.bf16.mxu0 %v2566_v40  ;;  %v2605_v31 = vld [vmem:[%s2956_s6 + $0x2b0] sm:$0xff]   ;;  %v312_v17 = vld [vmem:[#allocation2 + $0xe0] sm:$0xff] }
  0x63   : > { %2314 = vmatprep.subr.bf16.mxu1 %v2567_v41  ;;  %v2608_v41 = vld [vmem:[%s2956_s6 + $0x228] sm:$0xff]   ;;  %v2089_v18 = vcombine.high %v304_v16, %v312_v17  ;;  %v2088_v19 = vcombine.low %v304_v16, %v312_v17 }
  0x64   : > { %1533 = vmatmul.mubr.bf16.vlgmr.msra.gmra.mxu0 %v2064_v35  ;;  %v2084_v35 = vcombine.low %v302_v32, %v310_v33  ;;  %v2646_v32 = vld [vmem:[%s2956_s6 + $0x358] sm:$0xff]  }
  0x65   : > { %1582 = vmatmul.mubr.bf16.vlgmr.msra.gmra.mxu1 %v2066_v38  ;;  %2287 = vmatpush3.bf16.msra.mxu0 %v2568_v42  ;;  %v303_v38 = vld [vmem:[#allocation2 + $0x98] sm:$0xff] }
  0x66   : > { %2315 = vmatpush3.bf16.msra.mxu1 %v2569_v43  ;;  %2288 = vmatprep.subr.bf16.mxu0 %v2570_v44  ;;  %v2087_v40 = vcombine.high %v303_v38, %v311_v39  ;;  %v2086_v42 = vcombine.low %v303_v38, %v311_v39  ;;  %v2609_v43 = vld [vmem:[%s2956_s6 + $0x2a8] sm:$0xff]   ;;  %v2610_v44 = vld [vmem:[%s2956_s6 + $0x260] sm:$0xff]   ;;  %v2647_v33 = vld [vmem:[%s2956_s6 + $0x3d8] sm:$0xff]  }
  0x67   : > { %2316 = vmatprep.subr.bf16.mxu1 %v2571_v45  ;;  %1540 = vmatprep.mubr.bf16.mxu0 %v2081_v62  ;;  %v2611_v45 = vld [vmem:[%s2956_s6 + $0x2e0] sm:$0xff]   ;;  %v2652_v38 = vld [vmem:[%s2956_s6 + $0x310] sm:$0xff]  }
  0x68   : > { %1589 = vmatprep.mubr.bf16.mxu1 %v2083_v2  ;;  %v2628_v62 = vld [vmem:[%s2956_s6 + $0x200] sm:$0xff]   ;;  %v2653_v39 = vld [vmem:[%s2956_s6 + $0x390] sm:$0xff]  }
  0x69   : > { %2289 = vmatpush3.bf16.msra.mxu0 %v2572_v46  ;;  %v2612_v46 = vld [vmem:[%s2956_s6 + $0x220] sm:$0xff]  }
  0x6a   : > { %2317 = vmatpush3.bf16.msra.mxu1 %v2573_v47  ;;  %2290 = vmatprep.subr.bf16.mxu0 %v2574_v48  ;;  %v2613_v47 = vld [vmem:[%s2956_s6 + $0x2a0] sm:$0xff]   ;;  %v2614_v48 = vld [vmem:[%s2956_s6 + $0x258] sm:$0xff]  }
  0x6b   : > { %2318 = vmatprep.subr.bf16.mxu1 %v2575_v49  ;;  %v2615_v49 = vld [vmem:[%s2956_s6 + $0x2d8] sm:$0xff]  }
  0x6c   : > { %1541 = vmatmul.mubr.bf16.gmra.mxu0 %v2080_v1  ;;  %v296_v1 = vld [vmem:[#allocation2 + $0x60] sm:$0xff] }
  0x6d   : > { %2291 = vmatpush3.bf16.msra.mxu0 %v2576_v50  ;;  %1590 = vmatmul.mubr.bf16.gmra.mxu1 %v2082_v3  ;;  %v2616_v50 = vld [vmem:[%s2956_s6 + $0x218] sm:$0xff]   ;;  %v2072_v2 = vcombine.low %v288_v0, %v296_v1  ;;  %v2073_v3 = vcombine.high %v288_v0, %v296_v1 }
  0x6e   : > { %2319 = vmatpush3.bf16.msra.mxu1 %v2577_v51  ;;  %2292 = vmatprep.subr.bf16.mxu0 %v2578_v52  ;;  %v2617_v51 = vld [vmem:[%s2956_s6 + $0x298] sm:$0xff]   ;;  %v2618_v52 = vld [vmem:[%s2956_s6 + $0x250] sm:$0xff]  }
  0x6f   : > { %2320 = vmatprep.subr.bf16.mxu1 %v2579_v53  ;;  %1630 = vmatprep.mubr.bf16.mxu0 %v2069_v21  ;;  %v2619_v53 = vld [vmem:[%s2956_s6 + $0x2d0] sm:$0xff]   ;;  %v2639_v21 = vld [vmem:[%s2956_s6 + $0x3e8] sm:$0xff]  }
  0x70   : > { %1679 = vmatprep.mubr.bf16.mxu1 %v2071_v23  ;;  %v313_v23 = vld [vmem:[#allocation2 + $0xe8] sm:$0xff] }
  0x71   : > { %2293 = vmatpush3.bf16.msra.mxu0 %v2580_v54  ;;  %v2620_v54 = vld [vmem:[%s2956_s6 + $0x210] sm:$0xff]  }
  0x72   : > { %2321 = vmatpush3.bf16.msra.mxu1 %v2581_v55  ;;  %2294 = vmatprep.subr.bf16.mxu0 %v2582_v56  ;;  %v2621_v55 = vld [vmem:[%s2956_s6 + $0x290] sm:$0xff]   ;;  %v2622_v56 = vld [vmem:[%s2956_s6 + $0x248] sm:$0xff]  }
  0x73   : > { %2322 = vmatprep.subr.bf16.mxu1 %v2583_v57  ;;  %v2623_v57 = vld [vmem:[%s2956_s6 + $0x2c8] sm:$0xff]  }
  0x75   : > { %2295 = vmatpush3.bf16.msra.mxu0 %v2584_v58  ;;  %v2624_v58 = vld [vmem:[%s2956_s6 + $0x208] sm:$0xff]  }
  0x76   : > { %2323 = vmatpush3.bf16.msra.mxu1 %v2585_v59  ;;  %2296 = vmatprep.subr.bf16.mxu0 %v2586_v4  ;;  %v2625_v59 = vld [vmem:[%s2956_s6 + $0x288] sm:$0xff]  }
  0x77   : > { %2324 = vmatprep.subr.bf16.mxu1 %v2587_v5  ;;  %v289_v4 = vld [vmem:[#allocation2 + $0x28] sm:$0xff] }
  0x78   : > { %v297_v5 = vld [vmem:[#allocation2 + $0x68] sm:$0xff] }
  0x79   : > { %2297 = vmatpush3.bf16.msra.mxu0 %v2588_v6  ;;  %v2074_v6 = vcombine.low %v289_v4, %v297_v5 }
  0x7a   : > { %2325 = vmatpush3.bf16.msra.mxu1 %v2589_v7  ;;  %2298 = vmatprep.subr.bf16.mxu0 %v2590_v8  ;;  %v2075_v7 = vcombine.high %v289_v4, %v297_v5  ;;  %v2630_v8 = vld [vmem:[%s2956_s6 + $0x378] sm:$0xff]  }
  0x7b   : > { %2326 = vmatprep.subr.bf16.mxu1 %v2591_v9  ;;  %v2631_v9 = vld [vmem:[%s2956_s6 + $0x3f8] sm:$0xff]  }
  0x7d   : > { %2299 = vmatpush3.bf16.msra.mxu0 %v2592_v10  ;;  %v2632_v10 = vld [vmem:[%s2956_s6 + $0x338] sm:$0xff]  }
  0x7e   : > { %2327 = vmatpush3.bf16.msra.mxu1 %v2593_v11  ;;  %2300 = vmatprep.subr.bf16.mxu0 %v2594_v12  ;;  %v2633_v11 = vld [vmem:[%s2956_s6 + $0x3b8] sm:$0xff]   ;;  %v2634_v12 = vld [vmem:[%s2956_s6 + $0x370] sm:$0xff]  }
  0x7f   : > { %2328 = vmatprep.subr.bf16.mxu1 %v2595_v13  ;;  %v2635_v13 = vld [vmem:[%s2956_s6 + $0x3f0] sm:$0xff]  }
  0x81   : > { %2301 = vmatpush3.bf16.msra.mxu0 %v2596_v14  ;;  %v2636_v14 = vld [vmem:[%s2956_s6 + $0x330] sm:$0xff]  }
  0x82   : > { %2329 = vmatpush3.bf16.msra.mxu1 %v2597_v15  ;;  %2342 = vmatprep.subr.bf16.mxu0 %v2598_v24  ;;  %v2637_v15 = vld [vmem:[%s2956_s6 + $0x3b0] sm:$0xff]  }
  0x83   : > { %2370 = vmatprep.subr.bf16.mxu1 %v2599_v25  ;;  %v2640_v25 = vld [vmem:[%s2956_s6 + $0x328] sm:$0xff]  }
  0x84   : > { %1631 = vmatmul.mubr.bf16.vlgmr.msra.gmra.mxu0 %v2068_v20  ;;  %v2638_v20 = vld [vmem:[%s2956_s6 + $0x368] sm:$0xff]  }
  0x85   : > { %1680 = vmatmul.mubr.bf16.vlgmr.msra.gmra.mxu1 %v2070_v22  ;;  %2343 = vmatpush3.bf16.msra.mxu0 %v2600_v26  ;;  %v305_v22 = vld [vmem:[#allocation2 + $0xa8] sm:$0xff] }
  0x86   : > { %2371 = vmatpush3.bf16.msra.mxu1 %v2601_v27  ;;  %2344 = vmatprep.subr.bf16.mxu0 %v2602_v28  ;;  %v2091_v24 = vcombine.high %v305_v22, %v313_v23  ;;  %v2090_v26 = vcombine.low %v305_v22, %v313_v23  ;;  %v2641_v27 = vld [vmem:[%s2956_s6 + $0x3a8] sm:$0xff]   ;;  %v2642_v28 = vld [vmem:[%s2956_s6 + $0x360] sm:$0xff]  }
  0x87   : > { %2372 = vmatprep.subr.bf16.mxu1 %v2603_v29  ;;  %1638 = vmatprep.mubr.bf16.mxu0 %v2085_v34  ;;  %v2643_v29 = vld [vmem:[%s2956_s6 + $0x3e0] sm:$0xff]   ;;  %v2648_v34 = vld [vmem:[%s2956_s6 + $0x318] sm:$0xff]  }
  0x88   : > { %1687 = vmatprep.mubr.bf16.mxu1 %v2087_v40  ;;  %v2654_v40 = vld [vmem:[%s2956_s6 + $0x348] sm:$0xff]  }
  0x89   : > { %2345 = vmatpush3.bf16.msra.mxu0 %v2604_v30  ;;  %v2644_v30 = vld [vmem:[%s2956_s6 + $0x320] sm:$0xff]  }
  0x8a   : > { %2373 = vmatpush3.bf16.msra.mxu1 %v2605_v31  ;;  %2346 = vmatprep.subr.bf16.mxu0 %v2606_v36  ;;  %v2645_v31 = vld [vmem:[%s2956_s6 + $0x3a0] sm:$0xff]   ;;  %v2650_v36 = vld [vmem:[%s2956_s6 + $0x350] sm:$0xff]  }
  0x8b   : > { %2374 = vmatprep.subr.bf16.mxu1 %v2607_v37  ;;  %v2651_v37 = vld [vmem:[%s2956_s6 + $0x3d0] sm:$0xff]  }
  0x8c   : > { %1639 = vmatmul.mubr.bf16.gmra.mxu0 %v2084_v35  ;;  %v2649_v35 = vld [vmem:[%s2956_s6 + $0x398] sm:$0xff]  }
  0x8d   : > { %2347 = vmatpush3.bf16.msra.mxu0 %v2608_v41  ;;  %1688 = vmatmul.mubr.bf16.gmra.mxu1 %v2086_v42  ;;  %v2655_v41 = vld [vmem:[%s2956_s6 + $0x3c8] sm:$0xff]  }
  0x8e   : > { %2375 = vmatpush3.bf16.msra.mxu1 %v2609_v43  ;;  %2348 = vmatprep.subr.bf16.mxu0 %v2610_v44  ;;  %v2656_v42 = vld [vmem:[%s2956_s6 + $0x308] sm:$0xff]   ;;  %v2658_v44 = vld [vmem:[%s2956_s6 + $0x340] sm:$0xff]  }
  0x8f   : > { %2376 = vmatprep.subr.bf16.mxu1 %v2611_v45  ;;  %1728 = vmatprep.mubr.bf16.mxu0 %v2073_v3  ;;  %v2657_v43 = vld [vmem:[%s2956_s6 + $0x388] sm:$0xff]   ;;  %v2659_v45 = vld [vmem:[%s2956_s6 + $0x3c0] sm:$0xff]  }
  0x90   : > { %1777 = vmatprep.mubr.bf16.mxu1 %v2075_v7 }
  0x91   : > { %2349 = vmatpush3.bf16.msra.mxu0 %v2612_v46  ;;  %v2660_v46 = vld [vmem:[%s2956_s6 + $0x300] sm:$0xff]  }
  0x92   : > { %2377 = vmatpush3.bf16.msra.mxu1 %v2613_v47  ;;  %2350 = vmatprep.subr.bf16.mxu0 %v2614_v48  ;;  %v2661_v47 = vld [vmem:[%s2956_s6 + $0x380] sm:$0xff]   ;;  %v290_v48 = vld [vmem:[#allocation2 + $0x30] sm:$0xff]  ;;  %s2722_s6 = scalar_lea.vmem %s2721_s24, 1024 }
  0x93   : > { %2378 = vmatprep.subr.bf16.mxu1 %v2615_v49  ;;  %v298_v49 = vld [vmem:[#allocation2 + $0x70] sm:$0xff]  ;;  %p2724_p10 = scmp.lt.s32.totalorder %s2722_s6, %s2716_s21 }
  0x95   : > { %2351 = vmatpush3.bf16.msra.mxu0 %v2616_v50  ;;  %v291_v50 = vld [vmem:[#allocation2 + $0x38] sm:$0xff]  ;;  %p2725_p0 = por %p2724_p10, %p2723_p8 }
  0x96   : > { %2379 = vmatpush3.bf16.msra.mxu1 %v2617_v51  ;;  %2352 = vmatprep.subr.bf16.mxu0 %v2618_v52  ;;  %v2076_v51 = vcombine.low %v290_v48, %v298_v49  ;;  %v2077_v52 = vcombine.high %v290_v48, %v298_v49 }
  0x97   : > { %2380 = vmatprep.subr.bf16.mxu1 %v2619_v53  ;;  %v299_v53 = vld [vmem:[#allocation2 + $0x78] sm:$0xff]  ;;  %p2726_p1 = pnand %p2725_p0, %p2719_p6 }
  0x99   : > { %2353 = vmatpush3.bf16.msra.mxu0 %v2620_v54  ;;  %v306_v54 = vld [vmem:[#allocation2 + $0xb0] sm:$0xff] }
  0x9a   : > { %2381 = vmatpush3.bf16.msra.mxu1 %v2621_v55  ;;  %2354 = vmatprep.subr.bf16.mxu0 %v2622_v56  ;;  %v314_v55 = vld [vmem:[#allocation2 + $0xf0] sm:$0xff]  ;;  %v2078_v56 = vcombine.low %v291_v50, %v299_v53 }
  0x9b   : > { %2382 = vmatprep.subr.bf16.mxu1 %v2623_v57  ;;  %v2079_v57 = vcombine.high %v291_v50, %v299_v53 }
  0x9d   : > { %2355 = vmatpush3.bf16.msra.mxu0 %v2624_v58  ;;  %v2093_v58 = vcombine.high %v306_v54, %v314_v55 }
  0x9e   : > { %2383 = vmatpush3.bf16.msra.mxu1 %v2625_v59  ;;  %2356 = vmatprep.subr.bf16.mxu0 %v2626_v60  ;;  %v307_v59 = vld [vmem:[#allocation2 + $0xb8] sm:$0xff] }
  0x9f   : > { %2384 = vmatprep.subr.bf16.mxu1 %v2627_v61  ;;  %v315_v60 = vld [vmem:[#allocation2 + $0xf8] sm:$0xff] }
  0xa0   : > { %v2095_v61 = vcombine.high %v307_v59, %v315_v60 }
  0xa1   : > { %2357 = vmatpush3.bf16.msra.mxu0 %v2628_v62  ;;  %v2092_v62 = vcombine.low %v306_v54, %v314_v55 }
  0xa2   : > { %2385 = vmatpush3.bf16.msra.mxu1 %v2629_v63  ;;  %2398 = vmatprep.subr.bf16.mxu0 %v2630_v8  ;;  %v2094_v63 = vcombine.low %v307_v59, %v315_v60 }
  0xa3   : > { %2426 = vmatprep.subr.bf16.mxu1 %v2631_v9 }
  0xa4   : > { %1729 = vmatmul.mubr.bf16.vlgmr.msra.gmra.mxu0 %v2072_v2 }
  0xa5   : > { %1778 = vmatmul.mubr.bf16.vlgmr.msra.gmra.mxu1 %v2074_v6  ;;  %2399 = vmatpush3.bf16.msra.mxu0 %v2632_v10 }
  0xa6   : > { %2427 = vmatpush3.bf16.msra.mxu1 %v2633_v11  ;;  %2400 = vmatprep.subr.bf16.mxu0 %v2634_v12 }
  0xa7   : > { %2428 = vmatprep.subr.bf16.mxu1 %v2635_v13  ;;  %1736 = vmatprep.mubr.bf16.mxu0 %v2089_v18 }
  0xa8   : > { %1785 = vmatprep.mubr.bf16.mxu1 %v2091_v24 }
  0xa9   : > { %2401 = vmatpush3.bf16.msra.mxu0 %v2636_v14 }
  0xaa   : > { %2429 = vmatpush3.bf16.msra.mxu1 %v2637_v15  ;;  %2402 = vmatprep.subr.bf16.mxu0 %v2638_v20 }
  0xab   : > { %2430 = vmatprep.subr.bf16.mxu1 %v2639_v21 }
  0xac   : > { %1737 = vmatmul.mubr.bf16.gmra.mxu0 %v2088_v19 }
  0xad   : > { %2403 = vmatpush3.bf16.msra.mxu0 %v2640_v25  ;;  %1786 = vmatmul.mubr.bf16.gmra.mxu1 %v2090_v26 }
  0xae   : > { %2431 = vmatpush3.bf16.msra.mxu1 %v2641_v27  ;;  %2404 = vmatprep.subr.bf16.mxu0 %v2642_v28 }
  0xaf   : > { %2432 = vmatprep.subr.bf16.mxu1 %v2643_v29  ;;  %1826 = vmatprep.mubr.bf16.mxu0 %v2077_v52 }
  0xb0   : > { %1875 = vmatprep.mubr.bf16.mxu1 %v2079_v57 }
  0xb1   : > { %2405 = vmatpush3.bf16.msra.mxu0 %v2644_v30 }
  0xb2   : > { %2433 = vmatpush3.bf16.msra.mxu1 %v2645_v31  ;;  %2406 = vmatprep.subr.bf16.mxu0 %v2646_v32 }
  0xb3   : > { %2434 = vmatprep.subr.bf16.mxu1 %v2647_v33 }
  0xb5   : > { %2407 = vmatpush3.bf16.msra.mxu0 %v2648_v34 }
  0xb6   : > { %2435 = vmatpush3.bf16.msra.mxu1 %v2649_v35  ;;  %2408 = vmatprep.subr.bf16.mxu0 %v2650_v36 }
  0xb7   : > { %2436 = vmatprep.subr.bf16.mxu1 %v2651_v37 }
  0xb9   : > { %2409 = vmatpush3.bf16.msra.mxu0 %v2652_v38 }
  0xba   : > { %2437 = vmatpush3.bf16.msra.mxu1 %v2653_v39  ;;  %2410 = vmatprep.subr.bf16.mxu0 %v2654_v40 }
  0xbb   : > { %2438 = vmatprep.subr.bf16.mxu1 %v2655_v41 }
  0xbd   : > { %2411 = vmatpush3.bf16.msra.mxu0 %v2656_v42 }
  0xbe   : > { %2439 = vmatpush3.bf16.msra.mxu1 %v2657_v43  ;;  %2412 = vmatprep.subr.bf16.mxu0 %v2658_v44 }
  0xbf   : > { %2440 = vmatprep.subr.bf16.mxu1 %v2659_v45 }
  0xc1   : > { %2413 = vmatpush3.bf16.msra.mxu0 %v2660_v46 }
  0xc2   : > { %2441 = vmatpush3.bf16.msra.mxu1 %v2661_v47 }
  0xc4   : > { %1827 = vmatmul.mubr.bf16.vlgmr.msra.gmra.mxu0 %v2076_v51 }
  0xc5   : > { %1876 = vmatmul.mubr.bf16.vlgmr.msra.gmra.mxu1 %v2078_v56  ;;  %1834 = vmatprep.mubr.bf16.mxu0 %v2093_v58 }
  0xc6   : > { %1883 = vmatprep.mubr.bf16.mxu1 %v2095_v61 }
  0xcc   : > { %1835 = vmatmul.mubr.bf16.gmra.mxu0 %v2092_v62 }
  0xcd   : > { %1884 = vmatmul.mubr.bf16.gmra.mxu1 %v2094_v63 }
 0x124   : > { %v2246_v0 = vpop.f32.mrf.mxu0 }
 0x125   : > { %v2274_v2 = vpop.f32.mrf.mxu1 }
 0x126   : > { %v2247_v1 = vpop.f32.mrf.mxu0 }
 0x127   : > { %v2275_v4 = vpop.f32.mrf.mxu1  ;;  %v2248_v41 = vadd.f32 %v2247_v1, %v2246_v0 }
 0x128   : > { %v2249_v3 = vpop.f32.mrf.mxu0  ;;  %v2276_v42 = vadd.f32 %v2275_v4, %v2274_v2 }
 0x129   : > { %v2277_v6 = vpop.f32.mrf.mxu1 }
 0x12a   : > { %v2250_v5 = vpop.f32.mrf.mxu0  ;;  %v1584_v46 = vadd.f32 %v2276_v42, %v2248_v41 }
 0x12b   : > { %v2278_v8 = vpop.f32.mrf.mxu1  ;;  %v2251_v47 = vadd.f32 %v2250_v5, %v2249_v3 }
 0x12c   : > { %v2252_v7 = vpop.f32.mrf.mxu0  ;;  %v2279_v48 = vadd.f32 %v2278_v8, %v2277_v6 }
 0x12d   : > { %v2280_v10 = vpop.f32.mrf.mxu1 }
 0x12e   : > { %v2253_v9 = vpop.f32.mrf.mxu0  ;;  %v1587_v56 = vadd.f32 %v2279_v48, %v2251_v47 }
 0x12f   : > { %v2281_v12 = vpop.f32.mrf.mxu1  ;;  %v2254_v53 = vadd.f32 %v2253_v9, %v2252_v7 }
 0x130   : > { %v2255_v11 = vpop.f32.mrf.mxu0  ;;  %v2282_v54 = vadd.f32 %v2281_v12, %v2280_v10 }
 0x131   : > { %v2283_v14 = vpop.f32.mrf.mxu1 }
 0x132   : > { %v2256_v13 = vpop.f32.mrf.mxu0  ;;  %v1592_v62 = vadd.f32 %v2282_v54, %v2254_v53 }
 0x133   : > { %v2284_v16 = vpop.f32.mrf.mxu1  ;;  %v2257_v63 = vadd.f32 %v2256_v13, %v2255_v11 }
 0x134   : > { %v2285_v0 = vadd.f32 %v2284_v16, %v2283_v14 }
 0x144   : > { %v2302_v15 = vpop.f32.mrf.mxu0 }
 0x145   : > { %v2330_v18 = vpop.f32.mrf.mxu1 }
 0x146   : > { %v2303_v17 = vpop.f32.mrf.mxu0 }
 0x147   : > { %v2331_v20 = vpop.f32.mrf.mxu1  ;;  %v2304_v44 = vadd.f32 %v2303_v17, %v2302_v15  ;;  %v1595_v17 = vadd.f32 %v2285_v0, %v2257_v63 }
 0x148   : > { %v2305_v19 = vpop.f32.mrf.mxu0  ;;  %v2332_v51 = vadd.f32 %v2331_v20, %v2330_v18 }
 0x149   : > { %v2333_v22 = vpop.f32.mrf.mxu1  ;;  %v1633_v50 = vadd.f32 %v2304_v44, %v1584_v46 }
 0x14a   : > { %v2306_v21 = vpop.f32.mrf.mxu0 }
 0x14b   : > { %v2334_v24 = vpop.f32.mrf.mxu1  ;;  %v2307_v52 = vadd.f32 %v2306_v21, %v2305_v19  ;;  %v1682_v60 = vadd.f32 %v2332_v51, %v1633_v50 }
 0x14c   : > { %v2308_v23 = vpop.f32.mrf.mxu0  ;;  %v2335_v2 = vadd.f32 %v2334_v24, %v2333_v22 }
 0x14d   : > { %v2336_v25 = vpop.f32.mrf.mxu1  ;;  %v1636_v61 = vadd.f32 %v2307_v52, %v1587_v56 }
 0x14e   : > { %v2309_v26 = vpop.f32.mrf.mxu0 }
 0x14f   : > { %v2337_v27 = vpop.f32.mrf.mxu1  ;;  %v2310_v59 = vadd.f32 %v2309_v26, %v2308_v23  ;;  %v1685_v12 = vadd.f32 %v2335_v2, %v1636_v61 }
 0x150   : > { %v2311_v28 = vpop.f32.mrf.mxu0  ;;  %v2338_v8 = vadd.f32 %v2337_v27, %v2336_v25 }
 0x151   : > { %v2339_v29 = vpop.f32.mrf.mxu1  ;;  %v1641_v7 = vadd.f32 %v2310_v59, %v1592_v62 }
 0x152   : > { %v2312_v30 = vpop.f32.mrf.mxu0 }
 0x153   : > { %v2340_v32 = vpop.f32.mrf.mxu1  ;;  %v2313_v9 = vadd.f32 %v2312_v30, %v2311_v28  ;;  %v1690_v20 = vadd.f32 %v2338_v8, %v1641_v7 }
 0x154   : > { %v2341_v22 = vadd.f32 %v2340_v32, %v2339_v29  ;;  %v2225_v32 = vld [vmem:[%s281_s8] ss:$0 sm:$0xff] }
 0x155   : > { %v1644_v21 = vadd.f32 %v2313_v9, %v1595_v17 }
 0x157   : > { %v1693_v29 = vadd.f32 %v2341_v22, %v1644_v21 }
 0x164   : > { %v2358_v31 = vpop.f32.mrf.mxu0 }
 0x165   : > { %v2386_v33 = vpop.f32.mrf.mxu1 }
 0x166   : > { %v2359_v34 = vpop.f32.mrf.mxu0 }
 0x167   : > { %v2387_v35 = vpop.f32.mrf.mxu1  ;;  %v2360_v57 = vadd.f32 %v2359_v34, %v2358_v31 }
 0x168   : > { %v2361_v36 = vpop.f32.mrf.mxu0  ;;  %v2388_v4 = vadd.f32 %v2387_v35, %v2386_v33  ;;  %v2224_v33 = vld [vmem:[%s278_s28] ss:$0 sm:$0xff] }
 0x169   : > { %v2389_v37 = vpop.f32.mrf.mxu1  ;;  %v1731_v3 = vadd.f32 %v2360_v57, %v1682_v60 }
 0x16a   : > { %v2362_v38 = vpop.f32.mrf.mxu0 }
 0x16b   : > { %v2390_v39 = vpop.f32.mrf.mxu1  ;;  %v2363_v5 = vadd.f32 %v2362_v38, %v2361_v36  ;;  %v1780_v13 = vadd.f32 %v2388_v4, %v1731_v3 }
 0x16c   : > { %v2364_v40 = vpop.f32.mrf.mxu0  ;;  %v2391_v24 = vadd.f32 %v2390_v39, %v2389_v37 }
 0x16d   : > { %v2392_v43 = vpop.f32.mrf.mxu1  ;;  %v1734_v14 = vadd.f32 %v2363_v5, %v1685_v12 }
 0x16e   : > { %v2365_v45 = vpop.f32.mrf.mxu0 }
 0x16f   : > { %v2393_v49 = vpop.f32.mrf.mxu1  ;;  %v2366_v18 = vadd.f32 %v2365_v45, %v2364_v40  ;;  %v1783_v35 = vadd.f32 %v2391_v24, %v1734_v14 }
 0x170   : > { %v2367_v55 = vpop.f32.mrf.mxu0  ;;  %v2394_v30 = vadd.f32 %v2393_v49, %v2392_v43 }
 0x171   : > { %v2395_v58 = vpop.f32.mrf.mxu1  ;;  %v1739_v28 = vadd.f32 %v2366_v18, %v1690_v20 }
 0x172   : > { %v2368_v1 = vpop.f32.mrf.mxu0 }
 0x173   : > { %v2396_v6 = vpop.f32.mrf.mxu1  ;;  %v2369_v31 = vadd.f32 %v2368_v1, %v2367_v55  ;;  %v1788_v45 = vadd.f32 %v2394_v30, %v1739_v28 }
 0x174   : > { %v2397_v48 = vadd.f32 %v2396_v6, %v2395_v58 }
 0x175   : > { %v1742_v46 = vadd.f32 %v2369_v31, %v1693_v29 }
 0x177   : > { %v1791_v60 = vadd.f32 %v2397_v48, %v1742_v46 }
 0x184   : > { %v2414_v10 = vpop.f32.mrf.mxu0 }
 0x185   : > { %v2442_v15 = vpop.f32.mrf.mxu1 }
 0x186   : > { %v2415_v11 = vpop.f32.mrf.mxu0 }
 0x187   : > { %v2416_v16 = vadd.f32 %v2415_v11, %v2414_v10  ;;  %v2443_v19 = vpop.f32.mrf.mxu1 }
 0x188   : > { %v2417_v23 = vpop.f32.mrf.mxu0  ;;  %v2444_v26 = vadd.f32 %v2443_v19, %v2442_v15 }
 0x189   : > { %v1829_v25 = vadd.f32 %v2416_v16, %v1780_v13  ;;  %v2445_v27 = vpop.f32.mrf.mxu1 }
 0x18a   : > { %v2418_v34 = vpop.f32.mrf.mxu0 }
 0x18b   : > { %v1878_v36 = vadd.f32 %v2444_v26, %v1829_v25  ;;  %v2419_v38 = vadd.f32 %v2418_v34, %v2417_v23  ;;  %v2446_v40 = vpop.f32.mrf.mxu1 }
 0x18c   : > { %v2420_v37 = vpop.f32.mrf.mxu0  ;;  %v2447_v42 = vadd.f32 %v2446_v40, %v2445_v27 }
 0x18d   : > { %v1899_v39 = vmul.f32 %v2224_v33, %v1878_v36  ;;  %v1832_v41 = vadd.f32 %v2419_v38, %v1783_v35  ;;  %v2448_v44 = vpop.f32.mrf.mxu1 }
 0x18e   : > { %v2421_v47 = vpop.f32.mrf.mxu0 }
 0x18f   : > { %v1910_v43 = vadd.f32 %v2225_v32, %v1899_v39  ;;  %v1881_v49 = vadd.f32 %v2447_v42, %v1832_v41  ;;  %v2422_v50 = vadd.f32 %v2421_v47, %v2420_v37  ;;  %v2449_v51 = vpop.f32.mrf.mxu1 }
 0x190   : > { %v2423_v52 = vpop.f32.mrf.mxu0  ;;  %v2450_v56 = vadd.f32 %v2449_v51, %v2448_v44 }
 0x191   : > { %v1914_v53 = vmax.f32 %v1910_v43, 0.0  ;;  %v1900_v54 = vmul.f32 %v2224_v33, %v1881_v49  ;;  %v1837_v55 = vadd.f32 %v2422_v50, %v1788_v45  ;;  %v2451_v57 = vpop.f32.mrf.mxu1 }
 0x192   : > { %v2424_v59 = vpop.f32.mrf.mxu0 }
 0x193   : > { %1918 = vst [vmem:[%s274_s30] sm:$0xff] %v1914_v53  ;;  %v1911_v61 = vadd.f32 %v2225_v32, %v1900_v54  ;;  %v1886_v62 = vadd.f32 %v2450_v56, %v1837_v55  ;;  %v2425_v63 = vadd.f32 %v2424_v59, %v2423_v52  ;;  %v2452_v0 = vpop.f32.mrf.mxu1 }
 0x194   : > { %v2453_v3 = vadd.f32 %v2452_v0, %v2451_v57 }
 0x195   : > { %v1915_v58 = vmax.f32 %v1911_v61, 0.0  ;;  %v1901_v1 = vmul.f32 %v2224_v33, %v1886_v62  ;;  %v1840_v2 = vadd.f32 %v2425_v63, %v1791_v60 }
 0x197   : > { %1919 = vst [vmem:[%s274_s30 + $0x8] sm:$0xff] %v1915_v58  ;;  %v1912_v4 = vadd.f32 %v2225_v32, %v1901_v1  ;;  %v1889_v5 = vadd.f32 %v2453_v3, %v1840_v2 }
 0x199   : > { %v1916_v6 = vmax.f32 %v1912_v4, 0.0  ;;  %v1902_v7 = vmul.f32 %v2224_v33, %v1889_v5 }
 0x19b   : > { %1920 = vst [vmem:[%s274_s30 + $0x10] sm:$0xff] %v1916_v6  ;;  %v1913_v8 = vadd.f32 %v2225_v32, %v1902_v7 }
 0x19d   : > { %v1917_v9 = vmax.f32 %v1913_v8, 0.0 }
 0x19f   : > { %1921 = vst [vmem:[%s274_s30 + $0x18] sm:$0xff] %v1917_v9 }
 0x1a0   : > { %2729 = shalt.err (!%p2726_p1)
}
 0x1a1   : > { %s2730_s23 = scalar_lea.hbm %s3109_s20, 512  ;;  %s2734_s28 = scalar_lea.hbm %s3161_s4, 1024 }
 0x1a2   : > { %p2731_p5 = scmp.ne.s32.totalorder %s3109_s20, %s2730_s23  ;;  %p2735_p11 = scmp.lt.s32.totalorder %s3109_s20, %s3161_s4 }
 0x1a3   : > { %p2736_p2 = scmp.lt.s32.totalorder %s2734_s28, %s2730_s23 }
 0x1a4   : > { %p2732_p7 = pnand %p2731_p5, %p3180_p13 }
 0x1a5   : > { %p2737_p3 = por %p2736_p2, %p2735_p11 }
 0x1a6   : > { %p2733_p9 = pneg %p2732_p7 }
 0x1a8   : > { %p2738_p12 = pnand %p2737_p3, %p2733_p9 }
 0x1aa   : > { %2741 = shalt.err (!%p2738_p12)
}
 0x1ab   : > { %s2809_s8 = smov 128   ;;  %s2810_s5 = smov 256  }
 0x1ac   : > { %s2811_s30 = smov 8  }
 0x1ad   : > { %2460 = dma.vmem_to_hbm [thread:$0]  (%p3180_p13), %s3104_s9, 512, %s3109_s20, %s1923_s13, %s2809_s8, %s2810_s5, %s2811_s30  }
 0x1ae PF: > { %s3181_s11 = sld [smem:[#allocation11_spill]] }
 0x1af   : > { %s3182_s12 = sld [smem:[#allocation13_spill]] }
 0x1b0   : > { %s3183_s22 = sld [smem:[#allocation12_spill]] }
 0x1b4   : > { %s1953_s21 = sand.u32 1, %s3181_s11  }
 0x1b5   : > { %p3184_p4 = scmp.ne.s32.totalorder %s3182_s12, 0  ;;  %s1954_s18 = scalar_lea.sflag [#allocation4], %s1953_s21 }
 0x1b6   : > { %p3185_p6 = scmp.ge.s32.totalorder %s3183_s22, 2 }
 0x1b8   : > { %p2471_p8 = pnand %p3185_p6, %p3184_p4 }
 0x1ba   : > { %p2472_p10 = pneg %p2471_p8 }
 0x1bc   : > { %2775 = dma.done.wait (%p2472_p10), %s1954_s18, 512  }
 0x1bd   : > { %2777 = vsyncadd (%p2472_p10), %s1954_s18, 4294966784  ;;  %s21_s20 = sadd.s32 1, %s3183_s22   ;;  %s3186_s26 = smov %s2938_s15 }
 0x1be   : > { %p18_p0 = scmp.ge.s32.totalorder %s21_s20, 4   ;;  %s3187_s15 = smov %s2784_s16 }
 0x1bf   : > { %s3188_s16 = smov %s2788_s17  ;;  %s3189_s17 = smov %s3186_s26 }
 0x1c0   : > { %s3190_s18 = smov %s2796_s19  ;;  %s3191_s19 = smov %s3193_s7 }
 0x1c1   :  { %20 = sbr.rel (!%p18_p0) target bundleno = 7 (0x7), region = 93 }
 0x1c6   :  { %1959 = vsyncpa [#allocation3], 1 }
 0x1c7   :  { %1961 = vsyncpa [#allocation3 + $0x1], 1 }
 0x1c8   :  { %1962 = vsyncpa [#allocation6], 1 }
 0x1c9   :  { %1964 = vsyncpa [#allocation6 + $0x1], 1 }
 0x1ca   :  { %1965 = vsyncpa [#allocation4], 1 }
 0x1cb   :  { %1967 = vsyncpa [#allocation4 + $0x1], 1 }

</bundles_post_ra>
